<compile_context>
chip_gen: v6e
topology: v6e:2x2x1
jax: 0.10.0
libtpu: 0.0.40
codegen_flags: <defaults>
</compile_context>

<pallas_src>
import jax
import jax.numpy as jnp
from jax.experimental import pallas as pl
from jax.experimental.pallas import tpu as pltpu


# ---------------------------------------------------------------------------
# Pallas kernel: lane-dense tiled copy (only used when a fresh buffer is
# explicitly requested; the identity hot path never launches it).
# ---------------------------------------------------------------------------
def _copy_kernel(x_ref, o_ref):
    o_ref[...] = x_ref[...]


_LANES = 128          # lane-dense last dim (full vreg width)
_SUBLANE_ALIGN = 32   # row alignment robust to f32 / bf16 / int8 packing
_MAX_BLOCK_ROWS = 8192  # 8192 * 128 * 4B = 4 MiB per f32 tile buffer


def identity_dict_copy(x):
    """Materialize a copy of `x` through a lane-dense Pallas copy kernel."""
    orig_shape = x.shape
    total = int(x.size)

    flat = x.reshape(-1)

    # View the flat buffer as [rows, 128] so the last dim fills all 128 lanes.
    rows = pl.cdiv(total, _LANES)
    rows_aligned = ((rows + _SUBLANE_ALIGN - 1) // _SUBLANE_ALIGN) * _SUBLANE_ALIGN

    # Block rows: as large as possible (multi-MiB tiles) but capped so that
    # 4 double-buffered tiles stay well under every generation's VMEM limit.
    br = min(_MAX_BLOCK_ROWS, rows_aligned)

    # Pad rows up to a multiple of the block so the grid is exact — never fall
    # back to a single whole-array block.
    rows_padded = ((rows_aligned + br - 1) // br) * br
    padded_total = rows_padded * _LANES
    if padded_total != total:
        flat = jnp.pad(flat, (0, padded_total - total))
    x2d = flat.reshape(rows_padded, _LANES)

    grid = (rows_padded // br,)

    out2d = pl.pallas_call(
        _copy_kernel,
        out_shape=jax.ShapeDtypeStruct((rows_padded, _LANES), x2d.dtype),
        grid_spec=pltpu.PrefetchScalarGridSpec(
            num_scalar_prefetch=0,
            grid=grid,
            in_specs=[pl.BlockSpec((br, _LANES), lambda i: (i, 0))],
            out_specs=pl.BlockSpec((br, _LANES), lambda i: (i, 0)),
        ),
        compiler_params=pltpu.CompilerParams(
            dimension_semantics=("parallel",),   # v7x: shard rows over 2 TCs
            vmem_limit_bytes=48 << 20,           # headroom over v5e's 16 MiB default
        ),
    )(x2d)

    return out2d.reshape(-1)[:total].reshape(orig_shape)


# ---------------------------------------------------------------------------
# IdentityDict forward / encode / decode
# ---------------------------------------------------------------------------
def identity_dict_forward(x, output_features=False, *, materialize=False):
    """IdentityDict.forward.

    Hot path (materialize=False, the default): returns `x` directly — zero
    FLOPs, zero HBM traffic, no kernel launch.  Set materialize=True to force
    a fresh buffer via the Pallas copy kernel.
    """
    out = identity_dict_copy(x) if materialize else x
    if output_features:
        return out, out
    return out


def identity_dict_encode(x):
    return x


def identity_dict_decode(f):
    return f


if __name__ == "__main__":
    # IdentityDict(activation_dim=32); no learnable parameters exist.
    activation_dim = 32
    batch, seq = 2, 8

    key = jax.random.PRNGKey(0)
    x = jax.random.normal(key, (batch * seq, activation_dim), dtype=jnp.float32)

    # Hot path: pure identity, no kernel.
    y = identity_dict_forward(x)
    y = jax.block_until_ready(y)
    assert y.shape == x.shape and y.dtype == x.dtype
    assert jnp.array_equal(y, x)

    out, feats = identity_dict_forward(x, output_features=True)
    jax.block_until_ready(out)
    jax.block_until_ready(feats)
    assert jnp.array_equal(out, x) and jnp.array_equal(feats, x)

    # Materialized path: exercise the Pallas copy kernel once.
    y_copy = identity_dict_forward(x, materialize=True)
    y_copy = jax.block_until_ready(y_copy)
    assert y_copy.shape == x.shape and y_copy.dtype == x.dtype
    assert jnp.array_equal(y_copy, x)

    # encode / decode are identity.
    assert jnp.array_equal(identity_dict_encode(x), x)
    assert jnp.array_equal(identity_dict_decode(x), x)

    print("KERNEL_OK")
</pallas_src>

<mosaic_0001>
module attributes {stable_mosaic.version = 11 : i64} {
  func.func @_copy_kernel(%arg0: i32, %arg1: memref<32x128xf32, #tpu.memory_space<vmem>>, %arg2: memref<32x128xf32, #tpu.memory_space<vmem>>) attributes {dimension_semantics = [#tpu.dimension_semantics<parallel>], iteration_bounds = array<i64: 1>, scalar_prefetch = 0 : i64, scratch_operands = 0 : i64, tpu.core_type = #tpu.core_type<tc>, window_params = [{transform_indices = @transform_0, window_bounds = array<i64: 32, 128>}, {transform_indices = @transform_1, window_bounds = array<i64: 32, 128>}]} {
    %c0 = arith.constant 0 : index
    %c0_0 = arith.constant 0 : index
    %0 = vector.load %arg1[%c0, %c0_0] : memref<32x128xf32, #tpu.memory_space<vmem>>, vector<32x128xf32>
    %c0_1 = arith.constant 0 : index
    %c0_2 = arith.constant 0 : index
    %1 = vector.load %arg2[%c0_1, %c0_2] : memref<32x128xf32, #tpu.memory_space<vmem>>, vector<32x128xf32>
    tpu.vector_store %arg2[%c0_1, %c0_2], %0 {strides = array<i32>} : memref<32x128xf32, #tpu.memory_space<vmem>>, vector<32x128xf32>,
    return
  }
  func.func @transform_0(%arg0: i32) -> (i32, i32) {
    %c0_i32 = arith.constant 0 : i32
    %c0_i32_0 = arith.constant 0 : i32
    return %arg0, %c0_i32 : i32, i32
  }
  func.func @transform_1(%arg0: i32) -> (i32, i32) {
    %c0_i32 = arith.constant 0 : i32
    %c0_i32_0 = arith.constant 0 : i32
    return %arg0, %c0_i32 : i32, i32
  }
}

</mosaic_0001>

<bundles_post_ra>
// kernel: tpu_custom_call.1
= control target key start
LH: loop header
LB: loop body
LE: loop exit
PB: predicated region body
PF: predicated region fallthrough
CT: control target
= control target key end

     0   :  { %6 = vsyncpa [#allocation3], 0  ;;  %s116_s0 = inlined_call_operand.hbm [shape: f32[32,128], index: 0, kind: input, shape index: {}]   ;;  %s117_s1 = inlined_call_operand.hbm [shape: f32[32,128], index: 1, kind: output, shape index: {}]  }
   0x1   :  { %7 = vsyncpa [#allocation4], 0  ;;  %s96_s6 = smov [#allocation2]  }
   0x2   :  { %s13_s7 = sshll.u32 %s96_s6, 4  ;;  %s14_s7 = int_to_ptr.vmem [resolvable:$true] %s13_s7 }
   0x3   :  { %s60_s8 = scalar_lea.vmem %s14_s7, 512  ;;  %p65_p1 = scmp.lt.s32.totalorder %s14_s7, %s14_s7 }
   0x4   :  { %p61_p0 = scmp.ne.s32.totalorder %s14_s7, %s60_s8  ;;  %p66_p2 = scmp.lt.s32.totalorder %s60_s8, %s60_s8 }
   0x6   :  { %p67_p3 = por %p66_p2, %p65_p1 }
   0x8   :  { %p68_p4 = pnand %p67_p3, %p61_p0 }
   0xa   :  { %71 = shalt.err (!%p68_p4)
}
   0xb   :  { %s97_s9 = smov 128   ;;  %s98_s10 = smov 8  }
   0xc   :  { %19 = dma.hbm_to_vmem [thread:$0]  %s116_s0, 512, %s14_s7, [#allocation3], %s97_s9, %s97_s9, %s98_s10  }
   0xd   :  { %92 = dma.done.wait [#allocation3], 512  }
   0xe   :  { %93 = vsyncadd [#allocation3], 4294966784  ;;  %s99_s13 = smov [#allocation5]   ;;  %v23_v0 = vld [vmem:[#allocation2] sm:$0xff]  ;;  %v24_v1 = vld [vmem:[#allocation2 + $0x8] sm:$0xff] }
   0xf   :  { %s36_s14 = sshll.u32 %s99_s13, 4  ;;  %v25_v2 = vld [vmem:[#allocation2 + $0x10] sm:$0xff]  ;;  %27 = vst [vmem:[#allocation5] sm:$0xff] %v23_v0  ;;  %28 = vst [vmem:[#allocation5 + $0x8] sm:$0xff] %v24_v1  ;;  %v26_v3 = vld [vmem:[#allocation2 + $0x18] sm:$0xff]  ;;  %s37_s14 = int_to_ptr.vmem [resolvable:$true] %s36_s14 }
  0x10   :  { %29 = vst [vmem:[#allocation5 + $0x10] sm:$0xff] %v25_v2  ;;  %30 = vst [vmem:[#allocation5 + $0x18] sm:$0xff] %v26_v3  ;;  %s72_s15 = scalar_lea.vmem %s37_s14, 512  ;;  %p77_p6 = scmp.lt.s32.totalorder %s37_s14, %s37_s14 }
  0x11   :  { %p73_p5 = scmp.ne.s32.totalorder %s37_s14, %s72_s15  ;;  %p78_p7 = scmp.lt.s32.totalorder %s72_s15, %s72_s15 }
  0x13   :  { %p79_p8 = por %p78_p7, %p77_p6 }
  0x15   :  { %p80_p9 = pnand %p79_p8, %p73_p5 }
  0x17   :  { %83 = shalt.err (!%p80_p9)
}
  0x18   :  { %42 = dma.vmem_to_hbm [thread:$0]  %s37_s14, 512, %s117_s1, [#allocation4], %s97_s9, %s97_s9, %s98_s10  }
  0x19   :  { %94 = dma.done.wait [#allocation4], 512  }
  0x1a   :  { %95 = vsyncadd [#allocation4], 4294966784 }
  0x1b   :  { %46 = vsyncpa [#allocation3], 1 }
  0x1c   :  { %47 = vsyncpa [#allocation4], 1 }

</bundles_post_ra>
